<compile_context>
chip_gen: v7x
topology: tpu7x:2x2x1
jax: 0.10.0
libtpu: 0.0.40
codegen_flags: <defaults>
</compile_context>

<pallas_src>
import jax
import jax.numpy as jnp
from jax.experimental import pallas as pl
from jax.experimental.pallas import tpu as pltpu


def _mlp_kernel(x_ref, w1_ref, b1_ref, w2_ref, b2_ref, o_ref):
    # fc1: bf16 MXU matmul, f32 accumulate; bias + ReLU in f32 on the VPU.
    h = jnp.dot(x_ref[...], w1_ref[...], preferred_element_type=jnp.float32)
    h = jnp.maximum(h + b1_ref[...], 0.0)
    # fc2: cast hidden back to the compute dtype for the MXU, accumulate f32.
    y = jnp.dot(h.astype(w2_ref.dtype), w2_ref[...],
                preferred_element_type=jnp.float32)
    y = jnp.maximum(y + b2_ref[...], 0.0)
    o_ref[...] = y.astype(o_ref.dtype)


def _round_up(n, m):
    return ((n + m - 1) // m) * m


def simple_module_forward(x, w1, b1, w2, b2, *, block_rows=2048,
                          compute_dtype=jnp.bfloat16):
    """relu(relu(x @ w1 + b1) @ w2 + b2)

    x : (B, input_size) f32
    w1: (input_size, 16)  b1: (16,)     (nn.Linear weights pre-transposed to (in, out))
    w2: (16, 32)          b2: (32,)
    Returns (B, 32) f32.
    """
    B, D = x.shape
    H1 = w1.shape[1]
    H2 = w2.shape[1]

    # Lane-packing factor: pack p batch rows per physical row so the output
    # (p*H2 = 128) and, for D=32, the input occupy all 128 lanes.
    assert 128 % H2 == 0
    p = 128 // H2  # = 4 for H2 == 32

    # Dense-row tile size (each dense row carries p batch rows). Must be a
    # multiple of 8 sublanes; per-tile VMEM (~block_rows * 0.75 KiB doubled)
    # stays far below the 32 MiB scoped limit on v7x.
    bd_needed = pl.cdiv(B, p)
    tbd = min(block_rows, _round_up(bd_needed, 8))
    bd = _round_up(bd_needed, tbd)            # pad so the grid divides evenly
    b_pad = bd * p

    # --- wrapper-side layout / dtype prep (runs once, outside the kernel) ---
    cdt = compute_dtype
    x_p = jnp.zeros((b_pad, D), x.dtype).at[:B].set(x)
    x_dense = x_p.reshape(bd, p * D).astype(cdt)              # (bd, p*D) lane-dense
    eye = jnp.eye(p, dtype=cdt)
    w1_blk = jnp.kron(eye, w1.astype(cdt))                    # (p*D,  p*H1) block-diag
    w2_blk = jnp.kron(eye, w2.astype(cdt))                    # (p*H1, p*H2) block-diag
    b1_t = jnp.tile(b1.astype(jnp.float32), p).reshape(1, p * H1)
    b2_t = jnp.tile(b2.astype(jnp.float32), p).reshape(1, p * H2)

    out_dense = pl.pallas_call(
        _mlp_kernel,
        out_shape=jax.ShapeDtypeStruct((bd, p * H2), jnp.float32),
        grid=(bd // tbd,),
        in_specs=[
            pl.BlockSpec((tbd, p * D), lambda i: (i, 0)),     # batch-tiled input
            pl.BlockSpec(w1_blk.shape, lambda i: (0, 0)),     # weights stay resident
            pl.BlockSpec(b1_t.shape, lambda i: (0, 0)),
            pl.BlockSpec(w2_blk.shape, lambda i: (0, 0)),
            pl.BlockSpec(b2_t.shape, lambda i: (0, 0)),
        ],
        out_specs=pl.BlockSpec((tbd, p * H2), lambda i: (i, 0)),  # lane-dense store
        compiler_params=pltpu.CompilerParams(
            dimension_semantics=("parallel",),                # megacore on v7x
        ),
    )(x_dense, w1_blk, b1_t, w2_blk, b2_t)

    # (bd, p*H2) f32 row-major is bit-identical to (b_pad, H2); un-pack + un-pad.
    return out_dense.reshape(b_pad, H2)[:B]


if __name__ == "__main__":
    batch_size = 8
    input_size = 32  # SimpleModule(input_size)

    key = jax.random.PRNGKey(0)
    kx, kw1, kb1, kw2, kb2 = jax.random.split(key, 5)

    # Deterministic synthetic parameters (shapes match nn.Linear in SimpleModule,
    # stored (in, out) — i.e. PyTorch's (out, in) weight transposed once).
    x = jax.random.normal(kx, (batch_size, input_size), dtype=jnp.float32)
    w1 = jax.random.normal(kw1, (input_size, 16), dtype=jnp.float32) * 0.1
    b1 = jax.random.normal(kb1, (16,), dtype=jnp.float32) * 0.1
    w2 = jax.random.normal(kw2, (16, 32), dtype=jnp.float32) * 0.1
    b2 = jax.random.normal(kb2, (32,), dtype=jnp.float32) * 0.1

    out = simple_module_forward(x, w1, b1, w2, b2)
    out = jax.block_until_ready(out)

    # Pure-JAX reference mirroring the kernel's bf16-input / f32-accumulate numerics.
    xq = x.astype(jnp.bfloat16).astype(jnp.float32)
    w1q = w1.astype(jnp.bfloat16).astype(jnp.float32)
    w2q = w2.astype(jnp.bfloat16).astype(jnp.float32)
    h = jnp.maximum(xq @ w1q + b1, 0.0)
    h = h.astype(jnp.bfloat16).astype(jnp.float32)
    ref = jnp.maximum(h @ w2q + b2, 0.0)

    assert out.shape == (batch_size, 32)
    assert jnp.allclose(out, ref, atol=2e-2, rtol=2e-2), float(jnp.max(jnp.abs(out - ref)))

    print("KERNEL_OK")
</pallas_src>

<mosaic_0001>
module attributes {stable_mosaic.version = 11 : i64} {
  func.func @_mlp_kernel(%arg0: i32, %arg1: memref<8x128xbf16, #tpu.memory_space<vmem>>, %arg2: memref<128x64xbf16, #tpu.memory_space<vmem>>, %arg3: memref<1x64xf32, #tpu.memory_space<vmem>>, %arg4: memref<64x128xbf16, #tpu.memory_space<vmem>>, %arg5: memref<1x128xf32, #tpu.memory_space<vmem>>, %arg6: memref<8x128xf32, #tpu.memory_space<vmem>>) attributes {dimension_semantics = [#tpu.dimension_semantics<parallel>], iteration_bounds = array<i64: 1>, scalar_prefetch = 0 : i64, scratch_operands = 0 : i64, tpu.core_type = #tpu.core_type<tc>, window_params = [{transform_indices = @transform_0, window_bounds = array<i64: 8, 128>}, {pipeline_mode = #tpu.pipeline_mode<synchronous>, transform_indices = @transform_1, window_bounds = array<i64: 128, 64>}, {pipeline_mode = #tpu.pipeline_mode<synchronous>, transform_indices = @transform_2, window_bounds = array<i64: 1, 64>}, {pipeline_mode = #tpu.pipeline_mode<synchronous>, transform_indices = @transform_3, window_bounds = array<i64: 64, 128>}, {pipeline_mode = #tpu.pipeline_mode<synchronous>, transform_indices = @transform_4, window_bounds = array<i64: 1, 128>}, {transform_indices = @transform_5, window_bounds = array<i64: 8, 128>}]} {
    %c0 = arith.constant 0 : index
    %c0_0 = arith.constant 0 : index
    %0 = vector.load %arg1[%c0, %c0_0] : memref<8x128xbf16, #tpu.memory_space<vmem>>, vector<8x128xbf16>
    %c0_1 = arith.constant 0 : index
    %c0_2 = arith.constant 0 : index
    %1 = vector.load %arg2[%c0_1, %c0_2] : memref<128x64xbf16, #tpu.memory_space<vmem>>, vector<128x64xbf16>
    %cst = arith.constant dense<0.000000e+00> : vector<8x64xf32>
    %2 = tpu.matmul %0, %1, %cst {dimension_numbers = #tpu.dot_dimension_numbers<[1], [0], [0], [1], [0, 0, 1, 1], [], []>} : vector<8x128xbf16>, vector<128x64xbf16>, vector<8x64xf32> -> vector<8x64xf32>
    %c0_3 = arith.constant 0 : index
    %c0_4 = arith.constant 0 : index
    %3 = vector.load %arg3[%c0_3, %c0_4] : memref<1x64xf32, #tpu.memory_space<vmem>>, vector<1x64xf32>
    %4 = vector.broadcast %3 : vector<1x64xf32> to vector<8x64xf32>
    %5 = arith.addf %2, %4 : vector<8x64xf32>
    %cst_5 = arith.constant 0.000000e+00 : f32
    %6 = vector.broadcast %cst_5 : f32 to vector<8x64xf32>
    %7 = arith.maximumf %5, %6 : vector<8x64xf32>
    %8 = arith.truncf %7 : vector<8x64xf32> to vector<8x64xbf16>
    %c0_6 = arith.constant 0 : index
    %c0_7 = arith.constant 0 : index
    %9 = vector.load %arg4[%c0_6, %c0_7] : memref<64x128xbf16, #tpu.memory_space<vmem>>, vector<64x128xbf16>
    %cst_8 = arith.constant dense<0.000000e+00> : vector<8x128xf32>
    %10 = tpu.matmul %8, %9, %cst_8 {dimension_numbers = #tpu.dot_dimension_numbers<[1], [0], [0], [1], [0, 0, 1, 1], [], []>} : vector<8x64xbf16>, vector<64x128xbf16>, vector<8x128xf32> -> vector<8x128xf32>
    %c0_9 = arith.constant 0 : index
    %c0_10 = arith.constant 0 : index
    %11 = vector.load %arg5[%c0_9, %c0_10] : memref<1x128xf32, #tpu.memory_space<vmem>>, vector<1x128xf32>
    %12 = vector.broadcast %11 : vector<1x128xf32> to vector<8x128xf32>
    %13 = arith.addf %10, %12 : vector<8x128xf32>
    %cst_11 = arith.constant 0.000000e+00 : f32
    %14 = vector.broadcast %cst_11 : f32 to vector<8x128xf32>
    %15 = arith.maximumf %13, %14 : vector<8x128xf32>
    %c0_12 = arith.constant 0 : index
    %c0_13 = arith.constant 0 : index
    %16 = vector.load %arg6[%c0_12, %c0_13] : memref<8x128xf32, #tpu.memory_space<vmem>>, vector<8x128xf32>
    tpu.vector_store %arg6[%c0_12, %c0_13], %15 {strides = array<i32>} : memref<8x128xf32, #tpu.memory_space<vmem>>, vector<8x128xf32>,
    return
  }
  func.func @transform_0(%arg0: i32) -> (i32, i32) {
    %c0_i32 = arith.constant 0 : i32
    %c0_i32_0 = arith.constant 0 : i32
    return %arg0, %c0_i32 : i32, i32
  }
  func.func @transform_1(%arg0: i32) -> (i32, i32) {
    %c0_i32 = arith.constant 0 : i32
    %c0_i32_0 = arith.constant 0 : i32
    %c0_i32_1 = arith.constant 0 : i32
    return %c0_i32, %c0_i32_0 : i32, i32
  }
  func.func @transform_2(%arg0: i32) -> (i32, i32) {
    %c0_i32 = arith.constant 0 : i32
    %c0_i32_0 = arith.constant 0 : i32
    %c0_i32_1 = arith.constant 0 : i32
    return %c0_i32, %c0_i32_0 : i32, i32
  }
  func.func @transform_3(%arg0: i32) -> (i32, i32) {
    %c0_i32 = arith.constant 0 : i32
    %c0_i32_0 = arith.constant 0 : i32
    %c0_i32_1 = arith.constant 0 : i32
    return %c0_i32, %c0_i32_0 : i32, i32
  }
  func.func @transform_4(%arg0: i32) -> (i32, i32) {
    %c0_i32 = arith.constant 0 : i32
    %c0_i32_0 = arith.constant 0 : i32
    %c0_i32_1 = arith.constant 0 : i32
    return %c0_i32, %c0_i32_0 : i32, i32
  }
  func.func @transform_5(%arg0: i32) -> (i32, i32) {
    %c0_i32 = arith.constant 0 : i32
    %c0_i32_0 = arith.constant 0 : i32
    return %arg0, %c0_i32 : i32, i32
  }
}

</mosaic_0001>

<bundles_post_ra>
// kernel: tpu_custom_call.1
= control target key start
LH: loop header
LB: loop body
LE: loop exit
PB: predicated region body
PF: predicated region fallthrough
CT: control target
= control target key end

     0   :  { %v335_v1 = vmov 0.0   ;;  %vm336_vm0 = vmmov 0   ;;  %s425_s0 = inlined_call_operand.vmem [shape: bf16[8,128], index: 0, kind: input, shape index: {}]   ;;  %s426_s1 = inlined_call_operand.vmem [shape: bf16[128,64], index: 1, kind: input, shape index: {}]   ;;  %s427_s2 = inlined_call_operand.vmem [shape: f32[1,64], index: 2, kind: input, shape index: {}]   ;;  %s428_s3 = inlined_call_operand.vmem [shape: bf16[64,128], index: 3, kind: input, shape index: {}]   ;;  %s429_s4 = inlined_call_operand.vmem [shape: f32[1,128], index: 4, kind: input, shape index: {}]   ;;  %s430_s5 = inlined_call_operand.hbm [shape: f32[8,128], index: 5, kind: output, shape index: {}]  }
   0x1   :  { %v299_v0 = vld [vmem:[%s426_s1] sm:$0xff]   ;;  %264 = vmatprep.subr.bf16.mxu0 %v335_v1  ;;  %284 = vmatprep.subr.bf16.mxu1 %v335_v1  ;;  %v300_v2 = vld [vmem:[%s426_s1 + $0x8] sm:$0xff]   ;;  %v301_v3 = vld [vmem:[%s426_s1 + $0x10] sm:$0xff]  }
   0x2   :  { %265 = vmatpush3.bf16.msra.mxu0 %v299_v0  ;;  %280 = vmatprep.mubr.msk.bf16.mxu0 %vm336_vm0, %v335_v1  ;;  %v307_v4 = vld [vmem:[%s428_s3] sm:$0xff]   ;;  %v302_v5 = vld [vmem:[%s426_s1 + $0x18] sm:$0xff]   ;;  %v308_v6 = vld [vmem:[%s428_s3 + $0x8] sm:$0xff]  }
   0x3   :  { %266 = vmatprep.subr.bf16.mxu0 %v335_v1  ;;  %292 = vmatprep.mubr.msk.bf16.mxu1 %vm336_vm0, %v335_v1 }
   0x4   :  { %285 = vmatpush3.bf16.msra.mxu1 %v307_v4 }
   0x5   :  { %286 = vmatprep.subr.bf16.mxu1 %v335_v1 }
   0x6   :  { %267 = vmatpush3.bf16.msra.mxu0 %v300_v2 }
   0x7   :  { %268 = vmatprep.subr.bf16.mxu0 %v335_v1 }
   0xa   :  { %269 = vmatpush3.bf16.msra.mxu0 %v301_v3 }
   0xb   :  { %270 = vmatprep.subr.bf16.mxu0 %v335_v1 }
   0xc   :  { %10 = vsyncpa [#allocation3], 0  ;;  %v303_v7 = vld [vmem:[%s426_s1 + $0x20] sm:$0xff]   ;;  %287 = vmatpush3.bf16.msra.mxu1 %v308_v6  ;;  %v304_v8 = vld [vmem:[%s426_s1 + $0x28] sm:$0xff]   ;;  %vm175_vm1 = vcmask 523264  }
   0xd   :  { %288 = vmatprep.subr.bf16.mxu1 %v335_v1  ;;  %v305_v9 = vld [vmem:[%s426_s1 + $0x30] sm:$0xff]   ;;  %v306_v10 = vld [vmem:[%s426_s1 + $0x38] sm:$0xff]   ;;  %v22_v11 = vld [vmem:[%s425_s0] sm:$0xf] }
   0xe   :  { %271 = vmatpush3.bf16.msra.mxu0 %v302_v5  ;;  %v309_v12 = vld [vmem:[%s428_s3 + $0x10] sm:$0xff]   ;;  %v310_v13 = vld [vmem:[%s428_s3 + $0x18] sm:$0xff]   ;;  %v235_v14 = vld [vmem:[%s427_s2] ss:$0 sm:$0xff]  ;;  %s337_s3 = smov [#allocation2]  }
   0xf   :  { %272 = vmatprep.subr.bf16.mxu0 %v335_v1  ;;  %v244_v22 = vld [vmem:[%s429_s4] ss:$0 sm:$0xff]  ;;  %s227_s21 = sshll.u32 %s337_s3, 4  ;;  %s228_s21 = int_to_ptr.vmem [resolvable:$true] %s227_s21 }
  0x10   :  { %289 = vmatpush3.bf16.msra.mxu1 %v309_v12  ;;  %s311_s2 = scalar_lea.vmem %s228_s21, 128  ;;  %p316_p1 = scmp.lt.s32.totalorder %s228_s21, %s228_s21 }
  0x11   :  { %290 = vmatprep.subr.bf16.mxu1 %v335_v1  ;;  %p312_p0 = scmp.ne.s32.totalorder %s228_s21, %s311_s2  ;;  %p317_p2 = scmp.lt.s32.totalorder %s311_s2, %s311_s2 }
  0x12   :  { %273 = vmatpush3.bf16.msra.mxu0 %v303_v7 }
  0x13   :  { %274 = vmatprep.subr.bf16.mxu0 %v335_v1  ;;  %p318_p3 = por %p317_p2, %p316_p1 }
  0x14   :  { %291 = vmatpush3.bf16.msra.mxu1 %v310_v13 }
  0x15   :  { %p319_p4 = pnand %p318_p3, %p312_p0 }
  0x16   :  { %275 = vmatpush3.bf16.msra.mxu0 %v304_v8 }
  0x17   :  { %276 = vmatprep.subr.bf16.mxu0 %v335_v1 }
  0x1a   :  { %277 = vmatpush3.bf16.msra.mxu0 %v305_v9 }
  0x1b   :  { %278 = vmatprep.subr.bf16.mxu0 %v335_v1 }
  0x1e   :  { %279 = vmatpush3.bf16.msra.mxu0 %v306_v10 }
  0x21   :  { %281 = vmatmul.mubr.bf16.vlgmr.msra.gmra.mrb[0].mxu0 %v22_v11 }
  0xf4   :  { %v128_v15 = vpop.f32.mrb[0].mxu0 }
  0xf5   :  { %v129_v16 = vadd.f32 %v235_v14, %v128_v15  ;;  %v282_v17 = vpop.f32.mrb[1].mxu0 }
  0xf6   :  { %v131_v18 = vpop.f32.mrb[2].mxu0 }
  0xf7   :  { %v134_v19 = vmax.f32 %v129_v16, 0.0  ;;  %v283_v20 = vpop.f32.mrb[3].mxu0 }
  0xf9   :  { %v135_v21 = vpack.c.bf16 %v134_v19, %v134_v19 }
  0xfb   :  { %293 = vmatmul.mubr.msk.bf16.vlgmr.msra.gmra.mrb[0].mxu1 %vm175_vm1, %v135_v21 }
 0x1ce   :  { %v213_v23 = vpop.f32.mrb[0].mxu1 }
 0x1cf   :  { %v214_v24 = vadd.f32 %v244_v22, %v213_v23  ;;  %v294_v25 = vpop.f32.mrb[1].mxu1 }
 0x1d0   :  { %v216_v26 = vpop.f32.mrb[2].mxu1 }
 0x1d1   :  { %v219_v27 = vmax.f32 %v214_v24, 0.0  ;;  %v295_v28 = vpop.f32.mrb[3].mxu1 }
 0x1d3   :  { %220 = vst [vmem:[#allocation2] sm:$0xff] %v219_v27 }
 0x1d4   :  { %322 = shalt.err (!%p319_p4)
}
 0x1d5   :  { %s323_s4 = scalar_lea.hbm %s430_s5, 128 }
 0x1d6   :  { %p324_p5 = scmp.ne.s32.totalorder %s430_s5, %s323_s4  ;;  %p327_p6 = scmp.lt.u32.totalorder %s323_s4, %s430_s5 }
 0x1d8   :  { %p329_p7 = pnand %p327_p6, %p324_p5 }
 0x1da   :  { %332 = shalt.err (!%p329_p7)
}
 0x1db   :  { %230 = dma.vmem_to_hbm [thread:$0]  %s228_s21, 128, %s430_s5, [#allocation3]  }
 0x1dc   :  { %333 = dma.done.wait [#allocation3], 128  }
 0x1dd   :  { %334 = vsyncadd [#allocation3], 4294967168 }
 0x1de   :  { %234 = vsyncpa [#allocation3], 1 }

</bundles_post_ra>
